<compile_context>
chip_gen: v6e
topology: v6e:2x2x1
jax: 0.10.0
libtpu: 0.0.40
codegen_flags: <defaults>
</compile_context>

<pallas_src>
import functools

import jax
import jax.numpy as jnp
from jax.experimental import pallas as pl
from jax.experimental.pallas import tpu as pltpu


def _round_up(n, m):
    return ((n + m - 1) // m) * m


def _simple_dnn_kernel(num_hidden, inv_L, *refs):
    # refs = (x, counts, table, [gamma, beta, W, b] * num_hidden, w_out_row, b_out, out)
    x_ref, cnt_ref, table_ref = refs[0], refs[1], refs[2]
    out_ref = refs[-1]
    params = refs[3:-1]

    # ---- CountMorganEmbedding(_transform(counts)) ----
    # _transform: slot j with counts[b, j] != 0 -> index j + 1, else 0 (padding row).
    # mean over dim=1 of the gathered embeddings  ==  (binary_mask @ table[1:]) / L
    # Mask is exactly representable in bf16; table cast to bf16 for native MXU throughput,
    # accumulation stays f32.
    mask = (cnt_ref[...] != 0).astype(jnp.bfloat16)
    emb = jnp.dot(mask, table_ref[...].astype(jnp.bfloat16),
                  preferred_element_type=jnp.float32) * inv_L

    # ---- torch.concat([x, embeddings], dim=-1), kept in registers (no VMEM roundtrip) ----
    h = jnp.concatenate([x_ref[...], emb], axis=-1)

    # ---- hidden blocks: LayerNorm -> Linear -> ReLU -> Dropout(identity) ----
    p = 0
    for _ in range(num_hidden):
        gamma = params[p][...]
        beta = params[p + 1][...]
        w = params[p + 2][...]
        b = params[p + 3][...]
        p += 4

        inv_d = 1.0 / h.shape[-1]
        s1 = jnp.sum(h, axis=-1, keepdims=True)
        s2 = jnp.sum(h * h, axis=-1, keepdims=True)
        mu = s1 * inv_d
        var = s2 * inv_d - mu * mu                    # biased variance (matches PyTorch LayerNorm)
        hn = (h - mu) * jax.lax.rsqrt(var + 1e-5)     # eps = 1e-5
        hn = hn * gamma + beta

        h = jnp.dot(hn, w, preferred_element_type=jnp.float32) + b
        h = jnp.maximum(h, 0.0)
        # TODO(synk): nn.Dropout is identity in eval mode; training-mode RNG dropout not implemented.

    # ---- output head: Linear(d_last, 1) as VPU mul + lane reduce (avoids an N=1 MXU pass) ----
    w_out_row = params[p][...]        # (1, d_last)
    b_out = params[p + 1][...]        # (1, 1)
    out_ref[...] = jnp.sum(h * w_out_row, axis=-1, keepdims=True) + b_out


def simple_dnn_forward(x, counts, emb_table, layer_params, out_params, *, batch_tile=256):
    B, input_dim = x.shape
    L = counts.shape[1]
    num_hidden = len(layer_params)

    # Batch-tile the grid; tiles must be sublane-aligned (multiple of 8). Pad batch if needed.
    TB = min(_round_up(batch_tile, 8), _round_up(max(B, 8), 8))
    B_pad = _round_up(B, TB)
    if B_pad != B:
        x = jnp.pad(x, ((0, B_pad - B), (0, 0)))
        counts = jnp.pad(counts, ((0, B_pad - B), (0, 0)))
    grid = (B_pad // TB,)

    w_out, b_out = out_params
    w_out_row = jnp.reshape(w_out, (1, -1))          # (1, d_last)

    # TODO(synk): counts is the HBM-dominant input; callers can pass an int8/uint8 nonzero mask
    # instead of f32 counts (the kernel only uses the !=0 pattern) to cut that DMA 4x.
    inputs = [x, counts, emb_table]
    for (g, bt, w, b) in layer_params:
        inputs += [g, bt, w, b]
    inputs += [w_out_row, b_out]

    def const_spec(a):
        nd = a.ndim
        return pl.BlockSpec(a.shape, lambda i, nd=nd: (0,) * nd)   # resident across the grid

    in_specs = [
        pl.BlockSpec((TB, input_dim), lambda i: (i, 0)),   # x, tiled over batch
        pl.BlockSpec((TB, L), lambda i: (i, 0)),           # counts, tiled over batch
        const_spec(emb_table),
    ] + [const_spec(a) for a in inputs[3:]]

    kernel = functools.partial(_simple_dnn_kernel, num_hidden, 1.0 / L)

    out = pl.pallas_call(
        kernel,
        out_shape=jax.ShapeDtypeStruct((B_pad, 1), jnp.float32),
        grid=grid,
        in_specs=in_specs,
        out_specs=pl.BlockSpec((TB, 1), lambda i: (i, 0)),
        compiler_params=pltpu.CompilerParams(
            dimension_semantics=("parallel",),
        ),
    )(*inputs)

    return out[:B]


def reference_forward(x, counts, emb_table, layer_params, out_params):
    """Plain-JAX reference with the same semantics as the PyTorch module (eval mode)."""
    L = counts.shape[1]
    mask = (counts != 0.0).astype(jnp.float32)
    emb = (mask @ emb_table) / L
    h = jnp.concatenate([x, emb], axis=-1)
    for (g, bt, w, b) in layer_params:
        mu = h.mean(-1, keepdims=True)
        var = ((h - mu) ** 2).mean(-1, keepdims=True)
        hn = (h - mu) / jnp.sqrt(var + 1e-5) * g + bt
        h = jnp.maximum(hn @ w + b, 0.0)
    w_out, b_out = out_params
    return h @ w_out + b_out


if __name__ == "__main__":
    # Small shapes consistent with the module:
    #   batch=2, input_dim=16, embed_dim=32, layer_dims=[64, 32]
    #   CountMorganEmbedding with bit_size=128, radius_size=4  ->  L = 512 fingerprint slots
    B = 2
    input_dim = 16
    embed_dim = 32
    layer_dims = [64, 32]
    bit_size, radius_size = 128, 4
    L = bit_size * radius_size

    dims = [embed_dim + input_dim] + layer_dims  # [48, 64, 32]

    key = jax.random.PRNGKey(0)
    keys = jax.random.split(key, 16)

    # Inputs
    x = jax.random.normal(keys[0], (B, input_dim), dtype=jnp.float32)
    counts = jax.random.randint(keys[1], (B, L), 0, 3).astype(jnp.float32)  # sparse-ish counts

    # Embedding table rows 1..L (padding row 0 is zero and folded out of the kernel math).
    emb_table = jax.random.normal(keys[2], (L, embed_dim), dtype=jnp.float32)

    # Per-block params: LayerNorm(gamma=1, beta=0 defaults), Linear (kaiming-uniform-ish), bias.
    layer_params = []
    for i in range(len(dims) - 1):
        d_in, d_out = dims[i], dims[i + 1]
        gamma = jnp.ones((1, d_in), dtype=jnp.float32)
        beta = jnp.zeros((1, d_in), dtype=jnp.float32)
        bound = (6.0 / d_in) ** 0.5
        w = jax.random.uniform(keys[3 + i], (d_in, d_out), jnp.float32, -bound, bound)
        b = jax.random.uniform(keys[8 + i], (1, d_out), jnp.float32,
                               -1.0 / d_in ** 0.5, 1.0 / d_in ** 0.5)
        layer_params.append((gamma, beta, w, b))

    d_last = dims[-1]
    bound = (6.0 / d_last) ** 0.5
    w_out = jax.random.uniform(keys[14], (d_last, 1), jnp.float32, -bound, bound)
    b_out = jax.random.uniform(keys[15], (1, 1), jnp.float32,
                               -1.0 / d_last ** 0.5, 1.0 / d_last ** 0.5)
    out_params = (w_out, b_out)

    y = simple_dnn_forward(x, counts, emb_table, layer_params, out_params)
    y = jax.block_until_ready(y)

    y_ref = reference_forward(x, counts, emb_table, layer_params, out_params)
    assert y.shape == (B, 1)
    assert jnp.allclose(y, y_ref, rtol=1e-2, atol=1e-2), (y, y_ref)

    print("KERNEL_OK")
</pallas_src>

<mosaic_0001>
module attributes {stable_mosaic.version = 11 : i64} {
  func.func @_simple_dnn_kernel(%arg0: i32, %arg1: memref<8x16xf32, #tpu.memory_space<vmem>>, %arg2: memref<8x512xf32, #tpu.memory_space<vmem>>, %arg3: memref<512x32xf32, #tpu.memory_space<vmem>>, %arg4: memref<1x48xf32, #tpu.memory_space<vmem>>, %arg5: memref<1x48xf32, #tpu.memory_space<vmem>>, %arg6: memref<48x64xf32, #tpu.memory_space<vmem>>, %arg7: memref<1x64xf32, #tpu.memory_space<vmem>>, %arg8: memref<1x64xf32, #tpu.memory_space<vmem>>, %arg9: memref<1x64xf32, #tpu.memory_space<vmem>>, %arg10: memref<64x32xf32, #tpu.memory_space<vmem>>, %arg11: memref<1x32xf32, #tpu.memory_space<vmem>>, %arg12: memref<1x32xf32, #tpu.memory_space<vmem>>, %arg13: memref<1x1xf32, #tpu.memory_space<vmem>>, %arg14: memref<8x1xf32, #tpu.memory_space<vmem>>) attributes {dimension_semantics = [#tpu.dimension_semantics<parallel>], iteration_bounds = array<i64: 1>, scalar_prefetch = 0 : i64, scratch_operands = 0 : i64, tpu.core_type = #tpu.core_type<tc>, window_params = [{transform_indices = @transform_0, window_bounds = array<i64: 8, 16>}, {transform_indices = @transform_1, window_bounds = array<i64: 8, 512>}, {pipeline_mode = #tpu.pipeline_mode<synchronous>, transform_indices = @transform_2, window_bounds = array<i64: 512, 32>}, {pipeline_mode = #tpu.pipeline_mode<synchronous>, transform_indices = @transform_3, window_bounds = array<i64: 1, 48>}, {pipeline_mode = #tpu.pipeline_mode<synchronous>, transform_indices = @transform_4, window_bounds = array<i64: 1, 48>}, {pipeline_mode = #tpu.pipeline_mode<synchronous>, transform_indices = @transform_5, window_bounds = array<i64: 48, 64>}, {pipeline_mode = #tpu.pipeline_mode<synchronous>, transform_indices = @transform_6, window_bounds = array<i64: 1, 64>}, {pipeline_mode = #tpu.pipeline_mode<synchronous>, transform_indices = @transform_7, window_bounds = array<i64: 1, 64>}, {pipeline_mode = #tpu.pipeline_mode<synchronous>, transform_indices = @transform_8, window_bounds = array<i64: 1, 64>}, {pipeline_mode = #tpu.pipeline_mode<synchronous>, transform_indices = @transform_9, window_bounds = array<i64: 64, 32>}, {pipeline_mode = #tpu.pipeline_mode<synchronous>, transform_indices = @transform_10, window_bounds = array<i64: 1, 32>}, {pipeline_mode = #tpu.pipeline_mode<synchronous>, transform_indices = @transform_11, window_bounds = array<i64: 1, 32>}, {pipeline_mode = #tpu.pipeline_mode<synchronous>, transform_indices = @transform_12, window_bounds = array<i64: 1, 1>}, {transform_indices = @transform_13, window_bounds = array<i64: 8, 1>}]} {
    %c0 = arith.constant 0 : index
    %c0_0 = arith.constant 0 : index
    %0 = vector.load %arg2[%c0, %c0_0] : memref<8x512xf32, #tpu.memory_space<vmem>>, vector<8x512xf32>
    %cst = arith.constant 0.000000e+00 : f32
    %1 = vector.broadcast %cst : f32 to vector<8x512xf32>
    %2 = arith.cmpf one, %0, %1 : vector<8x512xf32>
    %3 = arith.extui %2 : vector<8x512xi1> to vector<8x512xi32>
    %4 = arith.sitofp %3 : vector<8x512xi32> to vector<8x512xf32>
    %5 = arith.truncf %4 : vector<8x512xf32> to vector<8x512xbf16>
    %c0_1 = arith.constant 0 : index
    %c0_2 = arith.constant 0 : index
    %6 = vector.load %arg3[%c0_1, %c0_2] : memref<512x32xf32, #tpu.memory_space<vmem>>, vector<512x32xf32>
    %7 = arith.truncf %6 : vector<512x32xf32> to vector<512x32xbf16>
    %cst_3 = arith.constant dense<0.000000e+00> : vector<8x32xf32>
    %8 = tpu.matmul %5, %7, %cst_3 {dimension_numbers = #tpu.dot_dimension_numbers<[1], [0], [0], [1], [0, 0, 1, 1], [], []>} : vector<8x512xbf16>, vector<512x32xbf16>, vector<8x32xf32> -> vector<8x32xf32>
    %cst_4 = arith.constant 0.001953125 : f32
    %9 = vector.broadcast %cst_4 : f32 to vector<8x32xf32>
    %10 = arith.mulf %8, %9 : vector<8x32xf32>
    %c0_5 = arith.constant 0 : index
    %c0_6 = arith.constant 0 : index
    %11 = vector.load %arg1[%c0_5, %c0_6] : memref<8x16xf32, #tpu.memory_space<vmem>>, vector<8x16xf32>
    %12 = tpu.concatenate %11, %10 in 1 : vector<8x16xf32>, vector<8x32xf32> -> vector<8x48xf32>
    %c0_7 = arith.constant 0 : index
    %c0_8 = arith.constant 0 : index
    %13 = vector.load %arg4[%c0_7, %c0_8] : memref<1x48xf32, #tpu.memory_space<vmem>>, vector<1x48xf32>
    %c0_9 = arith.constant 0 : index
    %c0_10 = arith.constant 0 : index
    %14 = vector.load %arg5[%c0_9, %c0_10] : memref<1x48xf32, #tpu.memory_space<vmem>>, vector<1x48xf32>
    %c0_11 = arith.constant 0 : index
    %c0_12 = arith.constant 0 : index
    %15 = vector.load %arg6[%c0_11, %c0_12] : memref<48x64xf32, #tpu.memory_space<vmem>>, vector<48x64xf32>
    %c0_13 = arith.constant 0 : index
    %c0_14 = arith.constant 0 : index
    %16 = vector.load %arg7[%c0_13, %c0_14] : memref<1x64xf32, #tpu.memory_space<vmem>>, vector<1x64xf32>
    %cst_15 = arith.constant dense<0.000000e+00> : vector<8xf32>
    %17 = vector.multi_reduction <add>, %12, %cst_15 [1] : vector<8x48xf32> to vector<8xf32>
    %18 = vector.shape_cast %17 : vector<8xf32> to vector<8x1xf32>
    %19 = arith.mulf %12, %12 : vector<8x48xf32>
    %cst_16 = arith.constant dense<0.000000e+00> : vector<8xf32>
    %20 = vector.multi_reduction <add>, %19, %cst_16 [1] : vector<8x48xf32> to vector<8xf32>
    %21 = vector.shape_cast %20 : vector<8xf32> to vector<8x1xf32>
    %cst_17 = arith.constant 0.020833334 : f32
    %22 = vector.broadcast %cst_17 : f32 to vector<8x1xf32>
    %23 = arith.mulf %18, %22 : vector<8x1xf32>
    %cst_18 = arith.constant 0.020833334 : f32
    %24 = vector.broadcast %cst_18 : f32 to vector<8x1xf32>
    %25 = arith.mulf %21, %24 : vector<8x1xf32>
    %26 = arith.mulf %23, %23 : vector<8x1xf32>
    %27 = arith.subf %25, %26 : vector<8x1xf32>
    %28 = vector.broadcast %23 : vector<8x1xf32> to vector<8x48xf32>
    %29 = arith.subf %12, %28 : vector<8x48xf32>
    %cst_19 = arith.constant 9.99999974E-6 : f32
    %30 = vector.broadcast %cst_19 : f32 to vector<8x1xf32>
    %31 = arith.addf %27, %30 : vector<8x1xf32>
    %32 = math.rsqrt %31 : vector<8x1xf32>
    %33 = vector.broadcast %32 : vector<8x1xf32> to vector<8x48xf32>
    %34 = arith.mulf %29, %33 : vector<8x48xf32>
    %35 = vector.broadcast %13 : vector<1x48xf32> to vector<8x48xf32>
    %36 = arith.mulf %34, %35 : vector<8x48xf32>
    %37 = vector.broadcast %14 : vector<1x48xf32> to vector<8x48xf32>
    %38 = arith.addf %36, %37 : vector<8x48xf32>
    %cst_20 = arith.constant dense<0.000000e+00> : vector<8x64xf32>
    %39 = tpu.matmul %38, %15, %cst_20 {dimension_numbers = #tpu.dot_dimension_numbers<[1], [0], [0], [1], [0, 0, 1, 1], [], []>} : vector<8x48xf32>, vector<48x64xf32>, vector<8x64xf32> -> vector<8x64xf32>
    %40 = vector.broadcast %16 : vector<1x64xf32> to vector<8x64xf32>
    %41 = arith.addf %39, %40 : vector<8x64xf32>
    %cst_21 = arith.constant 0.000000e+00 : f32
    %42 = vector.broadcast %cst_21 : f32 to vector<8x64xf32>
    %43 = arith.maximumf %41, %42 : vector<8x64xf32>
    %c0_22 = arith.constant 0 : index
    %c0_23 = arith.constant 0 : index
    %44 = vector.load %arg8[%c0_22, %c0_23] : memref<1x64xf32, #tpu.memory_space<vmem>>, vector<1x64xf32>
    %c0_24 = arith.constant 0 : index
    %c0_25 = arith.constant 0 : index
    %45 = vector.load %arg9[%c0_24, %c0_25] : memref<1x64xf32, #tpu.memory_space<vmem>>, vector<1x64xf32>
    %c0_26 = arith.constant 0 : index
    %c0_27 = arith.constant 0 : index
    %46 = vector.load %arg10[%c0_26, %c0_27] : memref<64x32xf32, #tpu.memory_space<vmem>>, vector<64x32xf32>
    %c0_28 = arith.constant 0 : index
    %c0_29 = arith.constant 0 : index
    %47 = vector.load %arg11[%c0_28, %c0_29] : memref<1x32xf32, #tpu.memory_space<vmem>>, vector<1x32xf32>
    %cst_30 = arith.constant dense<0.000000e+00> : vector<8xf32>
    %48 = vector.multi_reduction <add>, %43, %cst_30 [1] : vector<8x64xf32> to vector<8xf32>
    %49 = vector.shape_cast %48 : vector<8xf32> to vector<8x1xf32>
    %50 = arith.mulf %43, %43 : vector<8x64xf32>
    %cst_31 = arith.constant dense<0.000000e+00> : vector<8xf32>
    %51 = vector.multi_reduction <add>, %50, %cst_31 [1] : vector<8x64xf32> to vector<8xf32>
    %52 = vector.shape_cast %51 : vector<8xf32> to vector<8x1xf32>
    %cst_32 = arith.constant 1.562500e-02 : f32
    %53 = vector.broadcast %cst_32 : f32 to vector<8x1xf32>
    %54 = arith.mulf %49, %53 : vector<8x1xf32>
    %cst_33 = arith.constant 1.562500e-02 : f32
    %55 = vector.broadcast %cst_33 : f32 to vector<8x1xf32>
    %56 = arith.mulf %52, %55 : vector<8x1xf32>
    %57 = arith.mulf %54, %54 : vector<8x1xf32>
    %58 = arith.subf %56, %57 : vector<8x1xf32>
    %59 = vector.broadcast %54 : vector<8x1xf32> to vector<8x64xf32>
    %60 = arith.subf %43, %59 : vector<8x64xf32>
    %cst_34 = arith.constant 9.99999974E-6 : f32
    %61 = vector.broadcast %cst_34 : f32 to vector<8x1xf32>
    %62 = arith.addf %58, %61 : vector<8x1xf32>
    %63 = math.rsqrt %62 : vector<8x1xf32>
    %64 = vector.broadcast %63 : vector<8x1xf32> to vector<8x64xf32>
    %65 = arith.mulf %60, %64 : vector<8x64xf32>
    %66 = vector.broadcast %44 : vector<1x64xf32> to vector<8x64xf32>
    %67 = arith.mulf %65, %66 : vector<8x64xf32>
    %68 = vector.broadcast %45 : vector<1x64xf32> to vector<8x64xf32>
    %69 = arith.addf %67, %68 : vector<8x64xf32>
    %cst_35 = arith.constant dense<0.000000e+00> : vector<8x32xf32>
    %70 = tpu.matmul %69, %46, %cst_35 {dimension_numbers = #tpu.dot_dimension_numbers<[1], [0], [0], [1], [0, 0, 1, 1], [], []>} : vector<8x64xf32>, vector<64x32xf32>, vector<8x32xf32> -> vector<8x32xf32>
    %71 = vector.broadcast %47 : vector<1x32xf32> to vector<8x32xf32>
    %72 = arith.addf %70, %71 : vector<8x32xf32>
    %cst_36 = arith.constant 0.000000e+00 : f32
    %73 = vector.broadcast %cst_36 : f32 to vector<8x32xf32>
    %74 = arith.maximumf %72, %73 : vector<8x32xf32>
    %c0_37 = arith.constant 0 : index
    %c0_38 = arith.constant 0 : index
    %75 = vector.load %arg12[%c0_37, %c0_38] : memref<1x32xf32, #tpu.memory_space<vmem>>, vector<1x32xf32>
    %c0_39 = arith.constant 0 : index
    %c0_40 = arith.constant 0 : index
    %76 = vector.load %arg13[%c0_39, %c0_40] : memref<1x1xf32, #tpu.memory_space<vmem>>, vector<1x1xf32>
    %77 = vector.broadcast %75 : vector<1x32xf32> to vector<8x32xf32>
    %78 = arith.mulf %74, %77 : vector<8x32xf32>
    %cst_41 = arith.constant dense<0.000000e+00> : vector<8xf32>
    %79 = vector.multi_reduction <add>, %78, %cst_41 [1] : vector<8x32xf32> to vector<8xf32>
    %80 = vector.shape_cast %79 : vector<8xf32> to vector<8x1xf32>
    %81 = vector.broadcast %76 : vector<1x1xf32> to vector<8x1xf32>
    %82 = arith.addf %80, %81 : vector<8x1xf32>
    %c0_42 = arith.constant 0 : index
    %c0_43 = arith.constant 0 : index
    %83 = vector.load %arg14[%c0_42, %c0_43] : memref<8x1xf32, #tpu.memory_space<vmem>>, vector<8x1xf32>
    tpu.vector_store %arg14[%c0_42, %c0_43], %82 {strides = array<i32>} : memref<8x1xf32, #tpu.memory_space<vmem>>, vector<8x1xf32>,
    return
  }
  func.func @transform_0(%arg0: i32) -> (i32, i32) {
    %c0_i32 = arith.constant 0 : i32
    %c0_i32_0 = arith.constant 0 : i32
    return %arg0, %c0_i32 : i32, i32
  }
  func.func @transform_1(%arg0: i32) -> (i32, i32) {
    %c0_i32 = arith.constant 0 : i32
    %c0_i32_0 = arith.constant 0 : i32
    return %arg0, %c0_i32 : i32, i32
  }
  func.func @transform_2(%arg0: i32) -> (i32, i32) {
    %c0_i32 = arith.constant 0 : i32
    %c0_i32_0 = arith.constant 0 : i32
    %c0_i32_1 = arith.constant 0 : i32
    return %c0_i32, %c0_i32_0 : i32, i32
  }
  func.func @transform_3(%arg0: i32) -> (i32, i32) {
    %c0_i32 = arith.constant 0 : i32
    %c0_i32_0 = arith.constant 0 : i32
    %c0_i32_1 = arith.constant 0 : i32
    return %c0_i32, %c0_i32_0 : i32, i32
  }
  func.func @transform_4(%arg0: i32) -> (i32, i32) {
    %c0_i32 = arith.constant 0 : i32
    %c0_i32_0 = arith.constant 0 : i32
    %c0_i32_1 = arith.constant 0 : i32
    return %c0_i32, %c0_i32_0 : i32, i32
  }
  func.func @transform_5(%arg0: i32) -> (i32, i32) {
    %c0_i32 = arith.constant 0 : i32
    %c0_i32_0 = arith.constant 0 : i32
    %c0_i32_1 = arith.constant 0 : i32
    return %c0_i32, %c0_i32_0 : i32, i32
  }
  func.func @transform_6(%arg0: i32) -> (i32, i32) {
    %c0_i32 = arith.constant 0 : i32
    %c0_i32_0 = arith.constant 0 : i32
    %c0_i32_1 = arith.constant 0 : i32
    return %c0_i32, %c0_i32_0 : i32, i32
  }
  func.func @transform_7(%arg0: i32) -> (i32, i32) {
    %c0_i32 = arith.constant 0 : i32
    %c0_i32_0 = arith.constant 0 : i32
    %c0_i32_1 = arith.constant 0 : i32
    return %c0_i32, %c0_i32_0 : i32, i32
  }
  func.func @transform_8(%arg0: i32) -> (i32, i32) {
    %c0_i32 = arith.constant 0 : i32
    %c0_i32_0 = arith.constant 0 : i32
    %c0_i32_1 = arith.constant 0 : i32
    return %c0_i32, %c0_i32_0 : i32, i32
  }
  func.func @transform_9(%arg0: i32) -> (i32, i32) {
    %c0_i32 = arith.constant 0 : i32
    %c0_i32_0 = arith.constant 0 : i32
    %c0_i32_1 = arith.constant 0 : i32
    return %c0_i32, %c0_i32_0 : i32, i32
  }
  func.func @transform_10(%arg0: i32) -> (i32, i32) {
    %c0_i32 = arith.constant 0 : i32
    %c0_i32_0 = arith.constant 0 : i32
    %c0_i32_1 = arith.constant 0 : i32
    return %c0_i32, %c0_i32_0 : i32, i32
  }
  func.func @transform_11(%arg0: i32) -> (i32, i32) {
    %c0_i32 = arith.constant 0 : i32
    %c0_i32_0 = arith.constant 0 : i32
    %c0_i32_1 = arith.constant 0 : i32
    return %c0_i32, %c0_i32_0 : i32, i32
  }
  func.func @transform_12(%arg0: i32) -> (i32, i32) {
    %c0_i32 = arith.constant 0 : i32
    %c0_i32_0 = arith.constant 0 : i32
    %c0_i32_1 = arith.constant 0 : i32
    return %c0_i32, %c0_i32_0 : i32, i32
  }
  func.func @transform_13(%arg0: i32) -> (i32, i32) {
    %c0_i32 = arith.constant 0 : i32
    %c0_i32_0 = arith.constant 0 : i32
    return %arg0, %c0_i32 : i32, i32
  }
}

</mosaic_0001>

<bundles_post_ra>
// kernel: tpu_custom_call.1
= control target key start
LH: loop header
LB: loop body
LE: loop exit
PB: predicated region body
PF: predicated region fallthrough
CT: control target
= control target key end

     0   :  { %vm249_vm8 = vcmask 130048   ;;  %vm260_vm9 = vcmask 392192   ;;  %vm644_vm10 = vmmov 0   ;;  %vm381_vm11 = vcmask 523264   ;;  %s1013_s2 = inlined_call_operand.vmem [shape: f32[512,32], index: 2, kind: input, shape index: {}]   ;;  %s1014_s1 = inlined_call_operand.vmem [shape: f32[8,512], index: 1, kind: input, shape index: {}]   ;;  %s1015_s0 = inlined_call_operand.vmem [shape: f32[8,16], index: 0, kind: input, shape index: {}]   ;;  %s1016_s5 = inlined_call_operand.vmem [shape: f32[48,64], index: 5, kind: input, shape index: {}]   ;;  %s1017_s3 = inlined_call_operand.vmem [shape: f32[1,48], index: 3, kind: input, shape index: {}]   ;;  %s1018_s4 = inlined_call_operand.vmem [shape: f32[1,48], index: 4, kind: input, shape index: {}]   ;;  %s1019_s6 = inlined_call_operand.vmem [shape: f32[1,64], index: 6, kind: input, shape index: {}]   ;;  %s1020_s9 = inlined_call_operand.vmem [shape: f32[64,32], index: 9, kind: input, shape index: {}]   ;;  %s1021_s7 = inlined_call_operand.vmem [shape: f32[1,64], index: 7, kind: input, shape index: {}]   ;;  %s1022_s8 = inlined_call_operand.vmem [shape: f32[1,64], index: 8, kind: input, shape index: {}]   ;;  %s1023_s12 = inlined_call_operand.<no memory space> [shape: f32[1,1], index: 12, kind: input, shape index: {}]   ;;  %s1024_s10 = inlined_call_operand.vmem [shape: f32[1,32], index: 10, kind: input, shape index: {}]   ;;  %s1025_s11 = inlined_call_operand.vmem [shape: f32[1,32], index: 11, kind: input, shape index: {}]   ;;  %s1026_s13 = inlined_call_operand.vmem [shape: f32[8,1], index: 13, kind: output, shape index: {}]  }
   0x1   :  { %v97_v0 = vld [vmem:[%s1013_s2 + $0xf0] sm:$0xff]  ;;  %v98_v1 = vld [vmem:[%s1013_s2 + $0xf8] sm:$0xff]  ;;  %v95_v11 = vld [vmem:[%s1013_s2 + $0xe0] sm:$0xff]  ;;  %vm500_vm12 = vcmask 261120   ;;  %vm511_vm13 = vcmask 7168  }
   0x2   :  { %v129_v2 = vld [vmem:[%s1013_s2 + $0x1f0] sm:$0xff]  ;;  %v146_v3 = vpack.c.bf16 %v98_v1, %v97_v0  ;;  %v130_v4 = vld [vmem:[%s1013_s2 + $0x1f8] sm:$0xff]  ;;  %v96_v13 = vld [vmem:[%s1013_s2 + $0xe8] sm:$0xff] }
   0x3   :  { %v81_v5 = vld [vmem:[%s1013_s2 + $0x70] sm:$0xff]  ;;  %v82_v6 = vld [vmem:[%s1013_s2 + $0x78] sm:$0xff]  ;;  %v162_v7 = vpack.c.bf16 %v130_v4, %v129_v2  ;;  %v127_v14 = vld [vmem:[%s1013_s2 + $0x1e0] sm:$0xff]  ;;  %v145_v16 = vpack.c.bf16 %v96_v13, %v95_v11 }
   0x4   :  { %v138_v8 = vpack.c.bf16 %v82_v6, %v81_v5  ;;  %v113_v9 = vld [vmem:[%s1013_s2 + $0x170] sm:$0xff]  ;;  %v114_v10 = vld [vmem:[%s1013_s2 + $0x178] sm:$0xff]  ;;  %539 = vmatprep.subr.bf16.mxu0 %v146_v3  ;;  %v128_v15 = vld [vmem:[%s1013_s2 + $0x1e8] sm:$0xff] }
   0x5   :  { %v154_v12 = vpack.c.bf16 %v114_v10, %v113_v9  ;;  %561 = vmatprep.subr.bf16.mxu1 %v162_v7  ;;  %v161_v17 = vpack.c.bf16 %v128_v15, %v127_v14  ;;  %v79_v18 = vld [vmem:[%s1013_s2 + $0x60] sm:$0xff]  ;;  %v80_v19 = vld [vmem:[%s1013_s2 + $0x68] sm:$0xff]  ;;  %v93_v23 = vld [vmem:[%s1013_s2 + $0xd0] sm:$0xff] }
   0x6   :  { %540 = vmatpush3.bf16.msra.mxu0 %v138_v8  ;;  %v111_v20 = vld [vmem:[%s1013_s2 + $0x160] sm:$0xff]  ;;  %v137_v21 = vpack.c.bf16 %v80_v19, %v79_v18  ;;  %v112_v22 = vld [vmem:[%s1013_s2 + $0x168] sm:$0xff]  ;;  %v94_v24 = vld [vmem:[%s1013_s2 + $0xd8] sm:$0xff] }
   0x7   :  { %562 = vmatpush3.bf16.msra.mxu1 %v154_v12  ;;  %541 = vmatprep.subr.bf16.mxu0 %v145_v16  ;;  %v153_v25 = vpack.c.bf16 %v112_v22, %v111_v20  ;;  %v144_v26 = vpack.c.bf16 %v94_v24, %v93_v23  ;;  %v125_v27 = vld [vmem:[%s1013_s2 + $0x1d0] sm:$0xff]  ;;  %v126_v28 = vld [vmem:[%s1013_s2 + $0x1d8] sm:$0xff]  ;;  %v91_v35 = vld [vmem:[%s1013_s2 + $0xc0] sm:$0xff] }
   0x8   :  { %563 = vmatprep.subr.bf16.mxu1 %v161_v17  ;;  %v77_v29 = vld [vmem:[%s1013_s2 + $0x50] sm:$0xff]  ;;  %v160_v30 = vpack.c.bf16 %v126_v28, %v125_v27  ;;  %v78_v31 = vld [vmem:[%s1013_s2 + $0x58] sm:$0xff]  ;;  %v92_v36 = vld [vmem:[%s1013_s2 + $0xc8] sm:$0xff] }
   0x9   :  { %v109_v32 = vld [vmem:[%s1013_s2 + $0x150] sm:$0xff]  ;;  %v110_v33 = vld [vmem:[%s1013_s2 + $0x158] sm:$0xff]  ;;  %v136_v34 = vpack.c.bf16 %v78_v31, %v77_v29  ;;  %v123_v37 = vld [vmem:[%s1013_s2 + $0x1c0] sm:$0xff]  ;;  %v143_v39 = vpack.c.bf16 %v92_v36, %v91_v35 }
   0xa   :  { %542 = vmatpush3.bf16.msra.mxu0 %v137_v21  ;;  %v152_v38 = vpack.c.bf16 %v110_v33, %v109_v32  ;;  %v124_v40 = vld [vmem:[%s1013_s2 + $0x1c8] sm:$0xff]  ;;  %v75_v41 = vld [vmem:[%s1013_s2 + $0x40] sm:$0xff]  ;;  %v89_v46 = vld [vmem:[%s1013_s2 + $0xb0] sm:$0xff] }
   0xb   :  { %564 = vmatpush3.bf16.msra.mxu1 %v153_v25  ;;  %543 = vmatprep.subr.bf16.mxu0 %v144_v26  ;;  %v76_v42 = vld [vmem:[%s1013_s2 + $0x48] sm:$0xff]  ;;  %v159_v43 = vpack.c.bf16 %v124_v40, %v123_v37  ;;  %v107_v44 = vld [vmem:[%s1013_s2 + $0x140] sm:$0xff]  ;;  %v90_v47 = vld [vmem:[%s1013_s2 + $0xb8] sm:$0xff]  ;;  %v641_v25 = vmov 1.0|1.0  }
   0xc   :  { %565 = vmatprep.subr.bf16.mxu1 %v160_v30  ;;  %v108_v45 = vld [vmem:[%s1013_s2 + $0x148] sm:$0xff]  ;;  %v121_v48 = vld [vmem:[%s1013_s2 + $0x1b0] sm:$0xff]  ;;  %v122_v49 = vld [vmem:[%s1013_s2 + $0x1b8] sm:$0xff]  ;;  %v135_v50 = vpack.c.bf16 %v76_v42, %v75_v41  ;;  %v142_v52 = vpack.c.bf16 %v90_v47, %v89_v46 }
   0xd   :  { %v151_v51 = vpack.c.bf16 %v108_v45, %v107_v44  ;;  %v73_v53 = vld [vmem:[%s1013_s2 + $0x30] sm:$0xff]  ;;  %v74_v54 = vld [vmem:[%s1013_s2 + $0x38] sm:$0xff]  ;;  %v158_v56 = vpack.c.bf16 %v122_v49, %v121_v48  ;;  %v87_v58 = vld [vmem:[%s1013_s2 + $0xa0] sm:$0xff] }
   0xe   :  { %544 = vmatpush3.bf16.msra.mxu0 %v136_v34  ;;  %v105_v55 = vld [vmem:[%s1013_s2 + $0x130] sm:$0xff]  ;;  %v106_v57 = vld [vmem:[%s1013_s2 + $0x138] sm:$0xff]  ;;  %v88_v59 = vld [vmem:[%s1013_s2 + $0xa8] sm:$0xff]  ;;  %v134_v62 = vpack.c.bf16 %v74_v54, %v73_v53 }
   0xf   :  { %566 = vmatpush3.bf16.msra.mxu1 %v152_v38  ;;  %545 = vmatprep.subr.bf16.mxu0 %v143_v39  ;;  %v119_v60 = vld [vmem:[%s1013_s2 + $0x1a0] sm:$0xff]  ;;  %v120_v61 = vld [vmem:[%s1013_s2 + $0x1a8] sm:$0xff]  ;;  %v150_v63 = vpack.c.bf16 %v106_v57, %v105_v55  ;;  %v141_v0 = vpack.c.bf16 %v88_v59, %v87_v58  ;;  %v85_v6 = vld [vmem:[%s1013_s2 + $0x90] sm:$0xff]  ;;  %v643_v55 = vmov 0.0  }
  0x10   :  { %567 = vmatprep.subr.bf16.mxu1 %v159_v43  ;;  %v71_v1 = vld [vmem:[%s1013_s2 + $0x20] sm:$0xff]  ;;  %v72_v2 = vld [vmem:[%s1013_s2 + $0x28] sm:$0xff]  ;;  %v157_v4 = vpack.c.bf16 %v120_v61, %v119_v60  ;;  %v86_v7 = vld [vmem:[%s1013_s2 + $0x98] sm:$0xff] }
  0x11   :  { %v103_v3 = vld [vmem:[%s1013_s2 + $0x120] sm:$0xff]  ;;  %v104_v5 = vld [vmem:[%s1013_s2 + $0x128] sm:$0xff]  ;;  %v117_v8 = vld [vmem:[%s1013_s2 + $0x190] sm:$0xff]  ;;  %v133_v10 = vpack.c.bf16 %v72_v2, %v71_v1  ;;  %v140_v14 = vpack.c.bf16 %v86_v7, %v85_v6 }
  0x12   :  { %546 = vmatpush3.bf16.msra.mxu0 %v135_v50  ;;  %v118_v9 = vld [vmem:[%s1013_s2 + $0x198] sm:$0xff]  ;;  %v69_v11 = vld [vmem:[%s1013_s2 + $0x10] sm:$0xff]  ;;  %v149_v13 = vpack.c.bf16 %v104_v5, %v103_v3  ;;  %v48_v16 = vld [vmem:[%s1014_s1 + $0x8] sm:$0xff] }
  0x13   :  { %568 = vmatpush3.bf16.msra.mxu1 %v151_v51  ;;  %547 = vmatprep.subr.bf16.mxu0 %v142_v52  ;;  %v70_v12 = vld [vmem:[%s1013_s2 + $0x18] sm:$0xff]  ;;  %v101_v15 = vld [vmem:[%s1013_s2 + $0x110] sm:$0xff]  ;;  %v156_v18 = vpack.c.bf16 %v118_v9, %v117_v8  ;;  %v83_v20 = vld [vmem:[%s1013_s2 + $0x80] sm:$0xff]  ;;  %vm52_vm0 = vcmp.ne.f32.partialorder %v48_v16, 0.0 }
  0x14   :  { %569 = vmatprep.subr.bf16.mxu1 %v158_v56  ;;  %v50_v17 = vld [vmem:[%s1014_s1 + $0x18] sm:$0xff]  ;;  %v84_v21 = vld [vmem:[%s1013_s2 + $0x88] sm:$0xff]  ;;  %v115_v22 = vld [vmem:[%s1013_s2 + $0x180] sm:$0xff]  ;;  %v132_v24 = vpack.c.bf16 %v70_v12, %v69_v11 }
  0x15   :  { %v102_v19 = vld [vmem:[%s1013_s2 + $0x118] sm:$0xff]  ;;  %vm54_vm1 = vcmp.ne.f32.partialorder %v50_v17, 0.0  ;;  %v116_v23 = vld [vmem:[%s1013_s2 + $0x188] sm:$0xff]  ;;  %vm521_vm2 = vmpackc.low %vm52_vm0, %vm52_vm0  ;;  %v139_v27 = vpack.c.bf16 %v84_v21, %v83_v20 }
  0x16   :  { %548 = vmatpush3.bf16.msra.mxu0 %v134_v62  ;;  %522 = vmatprep.mubr.msk.bf16.mxu0 %vm521_vm2, %v641_v25  ;;  %vm525_vm3 = vmpackc.low %vm54_vm1, %vm54_vm1  ;;  %v148_v26 = vpack.c.bf16 %v102_v19, %v101_v15  ;;  %v67_v28 = vld [vmem:[%s1013_s2] sm:$0xff]  ;;  %v68_v29 = vld [vmem:[%s1013_s2 + $0x8] sm:$0xff]  ;;  %v155_v30 = vpack.c.bf16 %v116_v23, %v115_v22 }
  0x17   :  { %570 = vmatpush3.bf16.msra.mxu1 %v150_v63  ;;  %549 = vmatprep.subr.bf16.mxu0 %v141_v0  ;;  %v99_v31 = vld [vmem:[%s1013_s2 + $0x100] sm:$0xff]  ;;  %v100_v32 = vld [vmem:[%s1013_s2 + $0x108] sm:$0xff]  ;;  %v49_v34 = vld [vmem:[%s1014_s1 + $0x10] sm:$0xff]  ;;  %v131_v35 = vpack.c.bf16 %v68_v29, %v67_v28 }
  0x18   :  { %571 = vmatprep.subr.bf16.mxu1 %v157_v4  ;;  %526 = vmatprep.mubr.msk.bf16.mxu1 %vm525_vm3, %v641_v25  ;;  %v47_v33 = vld [vmem:[%s1014_s1] sm:$0xff]  ;;  %v147_v36 = vpack.c.bf16 %v100_v32, %v99_v31  ;;  %vm53_vm5 = vcmp.ne.f32.partialorder %v49_v34, 0.0  ;;  %s642_s1 = smov 16   ;;  %v258_v56 = vld [vmem:[%s1016_s5 + $0x28] sm:$0xff]  ;;  %v256_v58 = vld [vmem:[%s1016_s5 + $0x18] sm:$0xff] }
  0x19   :  { %vm51_vm4 = vcmp.ne.f32.partialorder %v47_v33, 0.0  ;;  %vm527_vm7 = vmpackc.low %vm53_vm5, %vm53_vm5  ;;  %v244_v49 = vld [vmem:[%s1015_s0] sm:$0xff]  ;;  %v255_v59 = vld [vmem:[%s1016_s5 + $0x10] sm:$0xff] }
  0x1a   :  { %550 = vmatpush3.bf16.msra.mxu0 %v133_v10  ;;  %vm523_vm6 = vmpackc.low %vm51_vm4, %vm51_vm4  ;;  %v257_v57 = vld [vmem:[%s1016_s5 + $0x20] sm:$0xff]  ;;  %v254_v60 = vld [vmem:[%s1016_s5 + $0x8] sm:$0xff] }
  0x1b   :  { %572 = vmatpush3.bf16.msra.mxu1 %v149_v13  ;;  %551 = vmatprep.subr.bf16.mxu0 %v140_v14  ;;  %v253_v61 = vld [vmem:[%s1016_s5] sm:$0xff]  ;;  %v379_v20 = vld [vmem:[%s1020_s9 + $0x38] sm:$0xff]  ;;  %v378_v21 = vld [vmem:[%s1020_s9 + $0x30] sm:$0xff] }
  0x1c   :  { %573 = vmatprep.subr.bf16.mxu1 %v156_v18  ;;  %v529_v7 = vld [vmem:[%s1017_s3] ss:$0 sm:$0xff]  ;;  %v377_v22 = vld [vmem:[%s1020_s9 + $0x28] sm:$0xff] }
  0x1d   :  { %v530_v9 = vld [vmem:[%s1018_s4] ss:$0 sm:$0xff] }
  0x1e   :  { %552 = vmatpush3.bf16.msra.mxu0 %v132_v24  ;;  %v531_v12 = vld [vmem:[%s1019_s6] ss:$0 sm:$0xff]  ;;  %v375_v24 = vld [vmem:[%s1020_s9 + $0x18] sm:$0xff] }
  0x1f   :  { %574 = vmatpush3.bf16.msra.mxu1 %v148_v26  ;;  %553 = vmatprep.subr.bf16.mxu0 %v139_v27  ;;  %v376_v23 = vld [vmem:[%s1020_s9 + $0x20] sm:$0xff]  ;;  %v373_v26 = vld [vmem:[%s1020_s9 + $0x8] sm:$0xff] }
  0x20   :  { %575 = vmatprep.subr.bf16.mxu1 %v155_v30  ;;  %v372_v27 = vld [vmem:[%s1020_s9] sm:$0xff] }
  0x22   :  { %554 = vmatpush3.bf16.msra.mxu0 %v131_v35 }
  0x23   :  { %576 = vmatpush3.bf16.msra.mxu1 %v147_v36  ;;  %599 = vmatprep.subr.mxu0 %v643_v55 }
  0x24   :  { %614 = vmatprep.subr.mxu1 %v643_v55 }
  0x25   :  { %524 = vmatmul.mubr.msk.bf16.vlgmr.msra.gmra.mxu0 %vm523_vm6, %v641_v25 }
  0x26   :  { %528 = vmatmul.mubr.msk.bf16.vlgmr.msra.gmra.mxu1 %vm527_vm7, %v641_v25  ;;  %611 = vmatprep.mubr.msk.f32.mxu0 %vm644_vm10, %v643_v55  ;;  %v374_v25 = vld [vmem:[%s1020_s9 + $0x10] sm:$0xff] }
  0x27   :  { %600 = vmatpush3.msra.mxu0 %v258_v56  ;;  %630 = vmatprep.mubr.msk.f32.mxu1 %vm644_vm10, %v643_v55 }
  0x28   :  { %601 = vmatprep.subr.mxu0 %v643_v55  ;;  %615 = vmatpush3.msra.mxu1 %v379_v20 }
  0x29   :  { %602 = vmatpush3.msra.mxu0 %v257_v57  ;;  %616 = vmatprep.subr.mxu1 %v643_v55 }
  0x2a   :  { %603 = vmatprep.subr.mxu0 %v643_v55  ;;  %617 = vmatpush3.msra.mxu1 %v378_v21 }
  0x2b   :  { %604 = vmatpush3.msra.mxu0 %v256_v58  ;;  %618 = vmatprep.subr.mxu1 %v643_v55 }
  0x2c   :  { %605 = vmatprep.subr.mxu0 %v643_v55  ;;  %619 = vmatpush3.msra.mxu1 %v377_v22 }
  0x2d   :  { %606 = vmatpush3.msra.mxu0 %v255_v59  ;;  %620 = vmatprep.subr.mxu1 %v643_v55 }
  0x2e   :  { %607 = vmatprep.subr.mxu0 %v643_v55  ;;  %621 = vmatpush3.msra.mxu1 %v376_v23 }
  0x2f   :  { %608 = vmatpush3.msra.mxu0 %v254_v60  ;;  %622 = vmatprep.subr.mxu1 %v643_v55 }
  0x30   :  { %609 = vmatprep.subr.mxu0 %v643_v55  ;;  %623 = vmatpush3.msra.mxu1 %v375_v24 }
  0x31   :  { %610 = vmatpush3.msra.mxu0 %v253_v61  ;;  %624 = vmatprep.subr.mxu1 %v643_v55 }
  0x32   :  { %625 = vmatpush3.msra.mxu1 %v374_v25 }
  0x33   :  { %626 = vmatprep.subr.mxu1 %v643_v55 }
  0x34   :  { %627 = vmatpush3.msra.mxu1 %v373_v26 }
  0x35   :  { %628 = vmatprep.subr.mxu1 %v643_v55 }
  0x36   :  { %629 = vmatpush3.msra.mxu1 %v372_v27 }
  0xe5   :  { %v555_v37 = vpop.f32.mrf.mxu0 }
  0xe6   :  { %v577_v38 = vpop.f32.mrf.mxu1 }
  0xe7   :  { %v556_v39 = vpop.f32.mrf.mxu0 }
  0xe8   :  { %v557_v40 = vadd.f32 %v556_v39, %v555_v37  ;;  %v578_v41 = vpop.f32.mrf.mxu1  ;;  %v533_v37 = vld [vmem:[%s1021_s7] ss:$0 sm:$0xff] }
  0xe9   :  { %v579_v42 = vadd.f32 %v578_v41, %v577_v38  ;;  %v558_v43 = vpop.f32.mrf.mxu0  ;;  %v534_v39 = vld [vmem:[%s1022_s8] ss:$0 sm:$0xff] }
  0xea   :  { %v580_v44 = vpop.f32.mrf.mxu1  ;;  %v535_v43 = vld [vmem:[%s1024_s10] ss:$0 sm:$0xff] }
  0xeb   :  { %v559_v45 = vpop.f32.mrf.mxu0  ;;  %v238_v46 = vadd.f32 %v579_v42, %v557_v40  ;;  %v18_v42 = vstv %s1023_s12 }
  0xec   :  { %v581_v47 = vpop.f32.mrf.mxu1  ;;  %19 = vst [vmem:[#allocation2] sm:$0x1] %v18_v42 }
  0xed   :  { %v243_v48 = vmul.f32 0.001953125, %v238_v46  ;;  %v537_v47 = vld [vmem:[%s1025_s11] ss:$0 sm:$0xff] }
  0xef   :  { %246 = vrot.lane.b32.xlu0 %v243_v48, %s642_s1 }
 0x161   :  { %v247_v50 = vpop.permute.xlu0 %246 }
 0x162   :  { %v250_v51 = vsel %vm249_vm8, %v244_v49, %v247_v50 }
 0x163   :  { %v261_v52 = vsel %vm260_vm9, %v250_v51, 0.0  ;;  %v264_v53 = vmul.f32 %v250_v51, %v250_v51 }
 0x164   :  { %262 = vadd.xlane.f32.xlu0 %v261_v52 }
 0x165   :  { %v265_v54 = vsel %vm260_vm9, %v264_v53, 0.0 }
 0x166   :  { %266 = vadd.xlane.f32.xlu1 %v265_v54 }
 0x1ed   :  { %v263_v62 = vpop.xlane.xlu0 %262 }
 0x1ee   :  { %v268_v63 = vmul.f32 0.020833334, %v263_v62 }
 0x1ef   :  { %v267_v0 = vpop.xlane.xlu1 %266 }
 0x1f0   :  { %v270_v1 = vmul.f32 %v268_v63, %v268_v63  ;;  %v269_v2 = vmul.f32 0.020833334, %v267_v0  ;;  %v272_v5 = vsub.f32 %v250_v51, %v268_v63  ;;  %v538_v51 = vld [vmem:[#allocation2] ss:$0 sm:$0xff] }
 0x1f2   :  { %v271_v3 = vsub.f32 %v269_v2, %v270_v1 }
 0x1f4   :  { %v273_v4 = vadd.f32 1e-05, %v271_v3 }
 0x1f6   :  { %637 = vrsqrt.f32 %v273_v4 }
 0x203   :  { %v638_v6 = vpop.eup %637 }
 0x204   :  { %v275_v8 = vmul.f32 %v638_v6, %v272_v5 }
 0x206   :  { %v282_v10 = vmul.f32 %v529_v7, %v275_v8 }
 0x208   :  { %v289_v11 = vadd.f32 %v530_v9, %v282_v10 }
 0x20a   :  { %612 = vmatmul.mubr.msk.f32.vlgmr.msra.gmra.mxu0 %vm260_vm9, %v289_v11 }
 0x2ca   :  { %v365_v13 = vpop.f32.mrf.mxu0 }
 0x2cb   :  { %v366_v14 = vadd.f32 %v531_v12, %v365_v13 }
 0x2cc   :  { %v613_v15 = vpop.f32.mrf.mxu0 }
 0x2cd   :  { %v369_v16 = vmax.f32 %v366_v14, 0.0 }
 0x2cf   :  { %v382_v17 = vsel %vm381_vm11, %v369_v16, 0.0  ;;  %v385_v18 = vmul.f32 %v369_v16, %v369_v16 }
 0x2d0   :  { %383 = vadd.xlane.f32.xlu1 %v382_v17 }
 0x2d1   :  { %v386_v19 = vsel %vm381_vm11, %v385_v18, 0.0 }
 0x2d4   :  { %387 = vadd.xlane.f32.xlu1 %v386_v19 }
 0x359   :  { %v384_v28 = vpop.xlane.xlu1 %383 }
 0x35a   :  { %v389_v29 = vmul.f32 0.015625, %v384_v28 }
 0x35c   :  { %v391_v31 = vmul.f32 %v389_v29, %v389_v29  ;;  %v393_v35 = vsub.f32 %v369_v16, %v389_v29 }
 0x35d   :  { %v388_v30 = vpop.xlane.xlu1 %387 }
 0x35e   :  { %v390_v32 = vmul.f32 0.015625, %v388_v30 }
 0x360   :  { %v392_v33 = vsub.f32 %v390_v32, %v391_v31 }
 0x362   :  { %v394_v34 = vadd.f32 1e-05, %v392_v33 }
 0x364   :  { %639 = vrsqrt.f32 %v394_v34 }
 0x371   :  { %v640_v36 = vpop.eup %639 }
 0x372   :  { %v396_v38 = vmul.f32 %v640_v36, %v393_v35 }
 0x374   :  { %v403_v40 = vmul.f32 %v533_v37, %v396_v38 }
 0x376   :  { %v410_v41 = vadd.f32 %v534_v39, %v403_v40 }
 0x378   :  { %631 = vmatmul.mubr.msk.f32.vlgmr.msra.gmra.mxu1 %vm381_vm11, %v410_v41 }
 0x438   :  { %v486_v44 = vpop.f32.mrf.mxu1 }
 0x439   :  { %v487_v45 = vadd.f32 %v535_v43, %v486_v44 }
 0x43a   :  { %v632_v46 = vpop.f32.mrf.mxu1 }
 0x43b   :  { %v490_v48 = vmax.f32 %v487_v45, 0.0 }
 0x43d   :  { %v499_v49 = vmul.f32 %v537_v47, %v490_v48 }
 0x43f   :  { %v501_v50 = vsel %vm500_vm12, %v499_v49, 0.0 }
 0x440   :  { %502 = vadd.xlane.f32.xlu1 %v501_v50 }
 0x4c9   :  { %v503_v52 = vpop.xlane.xlu1 %502 }
 0x4ca   :  { %v510_v53 = vadd.f32 %v538_v51, %v503_v52 }
 0x4cc   :  { %512 = vst.msk [vmem:[%s1026_s13] sm:$0xff] %vm511_vm13, %v510_v53 }

</bundles_post_ra>
